<compile_context>
chip_gen: v6e
topology: v6e:2x2x1
jax: 0.10.0
libtpu: 0.0.40
codegen_flags: <defaults>
</compile_context>

<pallas_src>
import functools

import jax
import jax.numpy as jnp
from jax import lax
from jax.experimental import pallas as pl
from jax.experimental.pallas import tpu as pltpu


def attention_kernel(x_ref, w_ref, out_ref, attn_ref):
    # x_ref   : (TB, S, H) input block
    # w_ref   : (A, H) full weight matrix
    # out_ref : (TB, 1, H) pooled output block
    # attn_ref: (TB, S, A) attention-weights block
    TB, S, H = x_ref.shape
    A = w_ref.shape[0]

    x = x_ref[...]            # keep native dtype (bf16 would feed the MXU directly)
    w = w_ref[...]

    # scores = tanh(x @ W.T): one big (TB*S, H) @ (H, A) MXU matmul.
    scores = lax.dot_general(
        x.reshape(TB * S, H), w,
        (((1,), (1,)), ((), ())),
        preferred_element_type=jnp.float32)            # (TB*S, A) f32
    scores = jnp.tanh(scores).reshape(TB, S, A)

    # softmax over the sequence axis (torch dim=1), independently per batch.
    m = jnp.max(scores, axis=1, keepdims=True)         # (TB, 1, A)
    e = jnp.exp(scores - m)                            # (TB, S, A)
    denom = jnp.sum(e, axis=1, keepdims=True)          # (TB, 1, A)
    inv = pl.reciprocal(denom, approx=True)            # EUP vrcp (free slot)
    inv = inv * (2.0 - denom * inv)                    # one Newton step -> full precision
    attn = e * inv                                     # (TB, S, A) f32
    attn_ref[...] = attn.astype(attn_ref.dtype)

    # pooled[b,h] = sum_s (sum_a attn[b,s,a]) * x[b,s,h]  (second matmul folded away)
    rowsum = jnp.sum(attn, axis=2, keepdims=True)      # (TB, S, 1)
    pooled = jnp.sum(rowsum * x.astype(jnp.float32), axis=1, keepdims=True)
    out_ref[...] = pooled.astype(out_ref.dtype)        # (TB, 1, H)


def _choose_batch_tile(B, S, H, A, itemsize,
                       target_rows=512,
                       vmem_budget_bytes=24 * 1024 * 1024):
    """Pick how many batch elements to process per grid step."""
    # Enough flattened rows (TB*S) to keep the MXU / DMA pipeline busy.
    tb = max(1, target_rows // max(S, 1))
    # Fit double-buffered x block + attn/pooled output blocks in a conservative
    # VMEM budget (fits v7x's 64 MiB VMEM, well under the 32 MiB scoped default).
    per_b_bytes = 2 * (S * H + S * A + H) * itemsize
    tb = min(tb, max(1, vmem_budget_bytes // max(per_b_bytes, 1)))
    tb = min(tb, B)
    # Keep >= 2 grid steps when possible so both v7x TensorCores get work.
    if B >= 2:
        tb = min(tb, pl.cdiv(B, 2))
    return tb


@functools.partial(jax.jit, static_argnames=("batch_tile",))
def attention_forward(x, w, *, batch_tile=None):
    """x: (B, S, H); w: (A, H). Returns (pooled (B, H), attn (B, S, A))."""
    B, S, H = x.shape
    A = w.shape[0]
    TB = batch_tile if batch_tile is not None else _choose_batch_tile(
        B, S, H, A, x.dtype.itemsize)
    grid = (pl.cdiv(B, TB),)

    pooled, attn = pl.pallas_call(
        attention_kernel,
        out_shape=(
            jax.ShapeDtypeStruct((B, 1, H), x.dtype),
            jax.ShapeDtypeStruct((B, S, A), x.dtype),
        ),
        grid_spec=pltpu.PrefetchScalarGridSpec(
            num_scalar_prefetch=0,
            grid=grid,
            in_specs=[
                pl.BlockSpec((TB, S, H), lambda b: (b, 0, 0)),
                pl.BlockSpec((A, H), lambda b: (0, 0)),
            ],
            out_specs=[
                pl.BlockSpec((TB, 1, H), lambda b: (b, 0, 0)),
                pl.BlockSpec((TB, S, A), lambda b: (b, 0, 0)),
            ],
        ),
        compiler_params=pltpu.CompilerParams(
            dimension_semantics=("parallel",)),
    )(x, w)
    return pooled.reshape(B, H), attn


def xavier_uniform(key, shape, gain):
    # torch convention for a 2-D weight (out, in): fan_out=shape[0], fan_in=shape[1]
    fan_out, fan_in = shape
    bound = gain * jnp.sqrt(6.0 / (fan_in + fan_out))
    return jax.random.uniform(key, shape, jnp.float32, -bound, bound)


def reference_forward(x, w):
    scores = jnp.tanh(jnp.einsum("bsh,ah->bsa", x, w))
    attn = jax.nn.softmax(scores, axis=1)
    weighted = jnp.einsum("bsa,bsh->bah", attn, x)
    return weighted.sum(axis=1), attn


if __name__ == "__main__":
    B, S, H, A = 2, 8, 32, 16   # batch, seq, hidden_size, attention_size

    key = jax.random.PRNGKey(0)
    kx, kw = jax.random.split(key)
    x = jax.random.normal(kx, (B, S, H), jnp.float32)
    w = xavier_uniform(kw, (A, H), gain=1.414)

    pooled, attn = attention_forward(x, w)
    pooled = jax.block_until_ready(pooled)
    attn = jax.block_until_ready(attn)

    ref_pooled, ref_attn = reference_forward(x, w)
    assert pooled.shape == (B, H) and attn.shape == (B, S, A)
    assert jnp.allclose(pooled, ref_pooled, atol=1e-4, rtol=1e-4)
    assert jnp.allclose(attn, ref_attn, atol=1e-5, rtol=1e-5)

    print("KERNEL_OK")
</pallas_src>

<mosaic_0001>
module attributes {stable_mosaic.version = 11 : i64} {
  func.func @attention_kernel(%arg0: i32, %arg1: memref<1x8x32xf32, #tpu.memory_space<vmem>>, %arg2: memref<16x32xf32, #tpu.memory_space<vmem>>, %arg3: memref<1x1x32xf32, #tpu.memory_space<vmem>>, %arg4: memref<1x8x16xf32, #tpu.memory_space<vmem>>) attributes {dimension_semantics = [#tpu.dimension_semantics<parallel>], iteration_bounds = array<i64: 2>, scalar_prefetch = 0 : i64, scratch_operands = 0 : i64, tpu.core_type = #tpu.core_type<tc>, window_params = [{transform_indices = @transform_0, window_bounds = array<i64: 1, 8, 32>}, {pipeline_mode = #tpu.pipeline_mode<synchronous>, transform_indices = @transform_1, window_bounds = array<i64: 16, 32>}, {transform_indices = @transform_2, window_bounds = array<i64: 1, 1, 32>}, {transform_indices = @transform_3, window_bounds = array<i64: 1, 8, 16>}]} {
    %c0 = arith.constant 0 : index
    %c0_0 = arith.constant 0 : index
    %c0_1 = arith.constant 0 : index
    %0 = vector.load %arg1[%c0, %c0_0, %c0_1] : memref<1x8x32xf32, #tpu.memory_space<vmem>>, vector<1x8x32xf32>
    %c0_2 = arith.constant 0 : index
    %c0_3 = arith.constant 0 : index
    %1 = vector.load %arg2[%c0_2, %c0_3] : memref<16x32xf32, #tpu.memory_space<vmem>>, vector<16x32xf32>
    %2 = vector.shape_cast %0 : vector<1x8x32xf32> to vector<8x32xf32>
    %cst = arith.constant dense<0.000000e+00> : vector<8x16xf32>
    %3 = tpu.matmul %2, %1, %cst {dimension_numbers = #tpu.dot_dimension_numbers<[1], [1], [0], [0], [0, 0, 1, 0], [], []>} : vector<8x32xf32>, vector<16x32xf32>, vector<8x16xf32> -> vector<8x16xf32>
    %4 = math.tanh %3 : vector<8x16xf32>
    %5 = vector.shape_cast %4 : vector<8x16xf32> to vector<1x8x16xf32>
    %cst_4 = arith.constant dense<0xFF800000> : vector<1x16xf32>
    %6 = vector.multi_reduction <maximumf>, %5, %cst_4 [1] : vector<1x8x16xf32> to vector<1x16xf32>
    %7 = vector.shape_cast %6 : vector<1x16xf32> to vector<1x1x16xf32>
    %8 = vector.broadcast %7 : vector<1x1x16xf32> to vector<1x8x16xf32>
    %9 = arith.subf %5, %8 : vector<1x8x16xf32>
    %10 = math.exp %9 : vector<1x8x16xf32>
    %cst_5 = arith.constant dense<0.000000e+00> : vector<1x16xf32>
    %11 = vector.multi_reduction <add>, %10, %cst_5 [1] : vector<1x8x16xf32> to vector<1x16xf32>
    %12 = vector.shape_cast %11 : vector<1x16xf32> to vector<1x1x16xf32>
    %13 = tpu.reciprocal %12 {approx = true} : vector<1x1x16xf32> -> vector<1x1x16xf32>
    %14 = arith.mulf %12, %13 : vector<1x1x16xf32>
    %cst_6 = arith.constant 2.000000e+00 : f32
    %15 = vector.broadcast %cst_6 : f32 to vector<1x1x16xf32>
    %16 = arith.subf %15, %14 : vector<1x1x16xf32>
    %17 = arith.mulf %13, %16 : vector<1x1x16xf32>
    %18 = vector.broadcast %17 : vector<1x1x16xf32> to vector<1x8x16xf32>
    %19 = arith.mulf %10, %18 : vector<1x8x16xf32>
    %c0_7 = arith.constant 0 : index
    %c0_8 = arith.constant 0 : index
    %c0_9 = arith.constant 0 : index
    %20 = vector.load %arg4[%c0_7, %c0_8, %c0_9] : memref<1x8x16xf32, #tpu.memory_space<vmem>>, vector<1x8x16xf32>
    tpu.vector_store %arg4[%c0_7, %c0_8, %c0_9], %19 {strides = array<i32>} : memref<1x8x16xf32, #tpu.memory_space<vmem>>, vector<1x8x16xf32>,
    %cst_10 = arith.constant dense<0.000000e+00> : vector<1x8xf32>
    %21 = vector.multi_reduction <add>, %19, %cst_10 [2] : vector<1x8x16xf32> to vector<1x8xf32>
    %22 = vector.shape_cast %21 : vector<1x8xf32> to vector<1x8x1xf32>
    %23 = vector.broadcast %22 : vector<1x8x1xf32> to vector<1x8x32xf32>
    %24 = arith.mulf %23, %0 : vector<1x8x32xf32>
    %cst_11 = arith.constant dense<0.000000e+00> : vector<1x32xf32>
    %25 = vector.multi_reduction <add>, %24, %cst_11 [1] : vector<1x8x32xf32> to vector<1x32xf32>
    %26 = vector.shape_cast %25 : vector<1x32xf32> to vector<1x1x32xf32>
    %c0_12 = arith.constant 0 : index
    %c0_13 = arith.constant 0 : index
    %c0_14 = arith.constant 0 : index
    %27 = vector.load %arg3[%c0_12, %c0_13, %c0_14] : memref<1x1x32xf32, #tpu.memory_space<vmem>>, vector<1x1x32xf32>
    tpu.vector_store %arg3[%c0_12, %c0_13, %c0_14], %26 {strides = array<i32>} : memref<1x1x32xf32, #tpu.memory_space<vmem>>, vector<1x1x32xf32>,
    return
  }
  func.func @transform_0(%arg0: i32) -> (i32, i32, i32) {
    %c0_i32 = arith.constant 0 : i32
    %c0_i32_0 = arith.constant 0 : i32
    %c0_i32_1 = arith.constant 0 : i32
    return %arg0, %c0_i32, %c0_i32_0 : i32, i32, i32
  }
  func.func @transform_1(%arg0: i32) -> (i32, i32) {
    %c0_i32 = arith.constant 0 : i32
    %c0_i32_0 = arith.constant 0 : i32
    %c0_i32_1 = arith.constant 0 : i32
    return %c0_i32, %c0_i32_0 : i32, i32
  }
  func.func @transform_2(%arg0: i32) -> (i32, i32, i32) {
    %c0_i32 = arith.constant 0 : i32
    %c0_i32_0 = arith.constant 0 : i32
    %c0_i32_1 = arith.constant 0 : i32
    return %arg0, %c0_i32, %c0_i32_0 : i32, i32, i32
  }
  func.func @transform_3(%arg0: i32) -> (i32, i32, i32) {
    %c0_i32 = arith.constant 0 : i32
    %c0_i32_0 = arith.constant 0 : i32
    %c0_i32_1 = arith.constant 0 : i32
    return %arg0, %c0_i32, %c0_i32_0 : i32, i32, i32
  }
}

</mosaic_0001>

<bundles_post_ra>
// kernel: attention_forward.1
= control target key start
LH: loop header
LB: loop body
LE: loop exit
PB: predicated region body
PF: predicated region fallthrough
CT: control target
= control target key end

     0   :  { %9 = vsyncpa [#allocation3], 0  ;;  %s941_s0 = inlined_call_operand.hbm [shape: f32[2,8,32], index: 0, kind: input, shape index: {}]   ;;  %s942_s1 = inlined_call_operand.hbm [shape: f32[16,32], index: 1, kind: input, shape index: {}]   ;;  %s943_s2 = inlined_call_operand.hbm [shape: f32[2,1,32], index: 2, kind: output, shape index: {0}]   ;;  %s944_s3 = inlined_call_operand.hbm [shape: f32[2,8,16], index: 3, kind: output, shape index: {1}]  }
   0x1   :  { %11 = vsyncpa [#allocation3 + $0x1], 0 }
   0x2   :  { %12 = vsyncpa [#allocation6], 0 }
   0x3   :  { %13 = vsyncpa [#allocation4], 0 }
   0x4   :  { %15 = vsyncpa [#allocation4 + $0x1], 0 }
   0x5   :  { %16 = vsyncpa [#allocation9], 0 }
   0x6   :  { %18 = vsyncpa [#allocation9 + $0x1], 0  ;;  %s753_s12 = smov 0   ;;  %s755_s13 = smov 0  }
   0x7   :  { %s757_s14 = smov 0   ;;  %s759_s15 = smov 0  }
   0x8 LB: > { %s774_s16 = sadd.s32 4294967295, %s723_s15   ;;  %s471_s17 = sadd.s32 4294967294, %s723_s15   ;;  %s723_s15 = sphi %s759_s15, %s966_s15   ;;  %s719_s14 = sphi %s757_s14, %s965_s14   ;;  %s715_s13 = sphi %s755_s13, %s964_s13   ;;  %s711_s12 = sphi %s753_s12, %s963_s12  }
   0x9   : > { %p44_p0 = scmp.ne.s32.totalorder %s715_s13, %s711_s12  ;;  %p945_p1 = scmp.eq.s32.totalorder %s774_s16, 0 }
   0xa   : > { %p95_p3 = scmp.eq.s32.totalorder %s471_s17, 1  ;;  %p472_p5 = scmp.ge.s32.totalorder %s723_s15, 1 }
   0xb   : > { %p783_p4 = por %p945_p1, %p44_p0  ;;  %p128_p7 = scmp.lt.s32.totalorder %s723_s15, 3 }
   0xc   : > { %p788_p6 = por %p95_p3, %p44_p0  ;;  %s725_s21 = smov [#allocation5]  }
   0xd   : > { %s949_s18 = scalar_select %p783_p4, 1, 0 }
   0xe   : > { %s950_s19 = scalar_select %p788_p6, 1, 0 }
   0xf   : > { %p793_p8 = pnand %p472_p5, %p128_p7  ;;  %s140_s22 = sshll.u32 %s725_s21, 4  ;;  %s141_s22 = int_to_ptr.vmem [resolvable:$true] %s140_s22 }
  0x10   : > { %s807_s24 = sadd.s32 1, %s723_s15   ;;  %s31_s25 = sadd.s32 1, %s719_s14 }
  0x11   : > { %s951_s20 = scalar_select %p793_p8, 1, 0 }
  0x12   : > { %p509_p9 = pneg %p793_p8  ;;  %s28_s26 = ssub.s32 %s723_s15, %s807_s24 }
  0x13   : > { %s582_s27 = scalar_lea.vmem %s141_s22, 256  ;;  %p590_p5 = scmp.lt.s32.totalorder %s141_s22, %s141_s22 }
  0x14   : > { %p802_p11 = pnand %p509_p9, %p945_p1  ;;  %p583_p13 = scmp.ne.s32.totalorder %s141_s22, %s582_s27 }
  0x15   : > { %p591_p7 = scmp.lt.s32.totalorder %s582_s27, %s582_s27 }
  0x16   : > { %p573_p12 = pneg %p802_p11 }
  0x17   : > { %p592_p10 = por %p591_p7, %p590_p5 }
  0x18   : > { %p585_p0 = pnand %p583_p13, %p573_p12 }
  0x1a   : > { %p586_p3 = pneg %p585_p0 }
  0x1c   : > { %p593_p2 = pnand %p592_p10, %p586_p3 }
  0x1e   : > { %596 = shalt.err (!%p593_p2)
}
  0x1f   : > { %s726_s28 = smov 128   ;;  %s727_s29 = smov 8  }
  0x20   : > { %512 = dma.hbm_to_vmem [thread:$0]  (!%p802_p11), %s942_s1, 256, %s141_s22, [#allocation6], %s726_s28, %s726_s28, %s727_s29  }
  0x21   : > { %p29_p9 = scmp.eq.s32.totalorder %s28_s26, 0  ;;  %p38_p12 = scmp.ne.s32.totalorder %s719_s14, %s715_s13 }
  0x22   : > { %p39_p10 = scmp.eq.s32.totalorder %s723_s15, 0  ;;  %p525_p2 = scmp.lt.s32.totalorder %s723_s15, 2 }
  0x23   : > { %s824_s5 = scalar_select %p29_p9, %s719_s14, %s31_s25  }
  0x24   : > { %p40_p13 = por %p39_p10, %p38_p12  ;;  %p953_p0 = scmp.eq.s32.totalorder %s774_s16, 1 }
  0x25   : > { %s154_s7 = sand.u32 1, %s719_s14   ;;  %s476_s8 = sshll.u32 %s723_s15, 7 }
  0x26   : > { %p828_p3 = por %p953_p0, %p38_p12  ;;  %s475_s9 = sshll.u32 %s154_s7, 3 }
  0x27   : > { %s837_s17 = scalar_lea.hbm %s941_s0, %s476_s8  ;;  %s158_s21 = scalar_lea.vmem [#allocation2], %s475_s9 }
  0x28   : > { %s954_s6 = scalar_select %p828_p3, 1, 0 }
  0x29   : > { %s165_s22 = sshll.u32 %s158_s21, 4  ;;  %p839_p11 = pnand %p525_p2, %p40_p13  ;;  %s166_s22 = int_to_ptr.vmem [resolvable:$true] %s165_s22 }
  0x2a   : > { %s155_s25 = scalar_lea.sflag [#allocation3], %s154_s7  ;;  %s597_s26 = scalar_lea.hbm %s837_s17, 128 }
  0x2b   : > { %p598_p5 = scmp.ne.s32.totalorder %s837_s17, %s597_s26  ;;  %p599_p7 = pneg %p839_p11 }
  0x2c   : > { %s602_s29 = scalar_lea.hbm %s941_s0, 256  ;;  %p603_p10 = scmp.lt.s32.totalorder %s837_s17, %s941_s0 }
  0x2d   : > { %p600_p9 = pnand %p599_p7, %p598_p5  ;;  %p604_p2 = scmp.lt.s32.totalorder %s602_s29, %s597_s26 }
  0x2f   : > { %p601_p12 = pneg %p600_p9  ;;  %p605_p13 = por %p604_p2, %p603_p10 }
  0x31   : > { %p606_p0 = pnand %p605_p13, %p601_p12 }
  0x33   : > { %609 = shalt.err (!%p606_p0)
}
  0x34   : > { %s610_s8 = scalar_lea.vmem %s166_s22, 128  ;;  %s728_s7 = smov [#allocation2]  }
  0x35   : > { %p611_p1 = scmp.ne.s32.totalorder %s166_s22, %s610_s8  ;;  %s615_s9 = sshll.u32 %s728_s7, 4  ;;  %s616_s9 = int_to_ptr.vmem [resolvable:$false] %s615_s9 }
  0x36   : > { %s617_s10 = scalar_lea.vmem %s616_s9, 256  ;;  %p618_p5 = scmp.lt.s32.totalorder %s166_s22, %s616_s9 }
  0x37   : > { %p613_p6 = pnand %p611_p1, %p599_p7  ;;  %p619_p9 = scmp.lt.s32.totalorder %s617_s10, %s610_s8 }
  0x39   : > { %p614_p3 = pneg %p613_p6  ;;  %p620_p4 = por %p619_p9, %p618_p5 }
  0x3b   : > { %p621_p8 = pnand %p620_p4, %p614_p3 }
  0x3d   : > { %624 = shalt.err (!%p621_p8)
}
  0x3e   : > { %516 = dma.hbm_to_vmem [thread:$0]  (!%p839_p11), %s837_s17, 128, %s166_s22, %s155_s25  }
  0x3f   : > { %p956_p12 = scmp.ne.s32.totalorder %s951_s20, 0 }
  0x40   : > { %s860_s11 = sand.u32 (!%p956_p12), 1, %s715_s13   ;;  %p957_p1 = scmp.ne.s32.totalorder (!%p956_p12), %s949_s18, 0 }
  0x41   : > { %174 = sbr.rel (%p956_p12) target bundleno = 523 (0x20b), region = 28  ;;  %s478_s21 = sshll.u32 (!%p956_p12), %s860_s11, 3 }
  0x42   : > { %s177_s26 = scalar_lea.sflag (!%p956_p12), [#allocation3], %s860_s11  ;;  %s180_s27 = scalar_lea.vmem (!%p956_p12), [#allocation2], %s478_s21 }
  0x46   : > { %694 = dma.done.wait (%p957_p1), %s177_s26, 128  }
  0x47   : > { %696 = vsyncadd (%p957_p1), %s177_s26, 4294967168  ;;  %p958_p4 = scmp.eq.s32.totalorder %s774_s16, 0 }
  0x49   : > { %698 = dma.done.wait (%p958_p4), [#allocation6], 256   ;;  %p959_p6 = pmov %p958_p4 }
  0x4a   : > { %v729_v0 = vmov 0.0   ;;  %vm730_vm0 = vmmov 0   ;;  %vm214_vm1 = vcmask 261120   ;;  %v213_v1 = vld [vmem:[#allocation5 + $0x8] sm:$0xff]  ;;  %v212_v2 = vld [vmem:[#allocation5] sm:$0xff]  ;;  %v876_v3 = vld [vmem:[%s180_s27] sm:$0xff] }
  0x4b   : > { %700 = vsyncadd (%p959_p6), [#allocation6], 4294967040  ;;  %492 = vmatprep.subr.mxu0 %v729_v0  ;;  %496 = vmatprep.mubr.msk.f32.mxu0 %vm730_vm0, %v729_v0  ;;  %vm295_vm2 = vcmask 130048   ;;  %s210_s18 = scalar_lea.vmem [#allocation8], %s478_s21  ;;  %s486_s20 = sshll.u32 %s774_s16, 7 }
  0x4c   : > { %493 = vmatpush3.xpose.msk.msra.mxu0 %vm214_vm1, %v213_v1  ;;  %s363_s17 = sshll.u32 %s210_s18, 4  ;;  %s361_s25 = scalar_lea.hbm %s944_s3, %s486_s20  ;;  %s364_s17 = int_to_ptr.vmem [resolvable:$true] %s363_s17 }
  0x4d   : > { %494 = vmatprep.subr.mxu0 %v729_v0  ;;  %s337_s28 = scalar_lea.sflag [#allocation9], %s860_s11  ;;  %s625_s29 = scalar_lea.vmem %s364_s17, 128 }
  0x4e   : > { %p626_p8 = scmp.ne.s32.totalorder %s364_s17, %s625_s29  ;;  %p960_p3 = scmp.ne.s32.totalorder %s954_s6, 0 }
  0x4f   : > { %s731_s30 = smov [#allocation8]  }
  0x50   : > { %495 = vmatpush3.xpose.msk.msra.mxu0 %vm214_vm1, %v212_v2  ;;  %p627_p11 = pnand %p626_p8, %p960_p3  ;;  %s629_s4 = sshll.u32 %s731_s30, 4  ;;  %s630_s4 = int_to_ptr.vmem [resolvable:$false] %s629_s4 }
  0x51   : > { %s631_s8 = scalar_lea.vmem %s630_s4, 256  ;;  %p632_p10 = scmp.lt.s32.totalorder %s364_s17, %s630_s4 }
  0x52   : > { %p628_p7 = pneg %p627_p11  ;;  %p633_p2 = scmp.lt.s32.totalorder %s631_s8, %s625_s29 }
  0x53   : > { %497 = vmatmul.mubr.msk.f32.vlgmr.msra.gmra.mxu0 %vm214_vm1, %v876_v3 }
  0x54   : > { %p634_p13 = por %p633_p2, %p632_p10 }
  0x56   : > { %p635_p0 = pnand %p634_p13, %p628_p7 }
 0x113   : > { %v290_v4 = vpop.f32.mrf.mxu0 }
 0x114   : > { %565 = vtanh.f32 %v290_v4 }
 0x115   : > { %v498_v5 = vpop.f32.mrf.mxu0 }
 0x121   : > { %v566_v6 = vpop.eup %565 }
 0x122   : > { %v296_v7 = vsel %vm295_vm2, %v566_v6, -inf }
 0x123   : > { %v297_v8 = vrot.slane %v296_v7, 4 }
 0x125   : > { %v298_v9 = vmax.f32 %v296_v7, %v297_v8 }
 0x127   : > { %v299_v10 = vrot.slane %v298_v9, 2 }
 0x129   : > { %v300_v11 = vmax.f32 %v298_v9, %v299_v10 }
 0x12b   : > { %v301_v12 = vrot.slane %v300_v11, 1 }
 0x12d   : > { %v302_v13 = vmax.f32 %v300_v11, %v301_v12 }
 0x12f   : > { %v303_v14 = vsub.f32 %v566_v6, %v302_v13 }
 0x131   : > { %v304_v15 = vmul.f32 1.442695, %v303_v14 }
 0x133   : > { %567 = vpow2.f32 %v304_v15 }
 0x140   : > { %v568_v16 = vpop.eup %567 }
 0x141   : > { %v306_v17 = vsel %vm295_vm2, %v568_v16, 0.0 }
 0x142   : > { %v307_v18 = vrot.slane %v306_v17, 4 }
 0x144   : > { %v308_v19 = vadd.f32 %v307_v18, %v306_v17 }
 0x146   : > { %v309_v20 = vrot.slane %v308_v19, 2 }
 0x148   : > { %v310_v21 = vadd.f32 %v309_v20, %v308_v19 }
 0x14a   : > { %v311_v22 = vrot.slane %v310_v21, 1 }
 0x14c   : > { %v312_v23 = vadd.f32 %v311_v22, %v310_v21 }
 0x14e   : > { %569 = vrcp.f32 %v312_v23 }
 0x15b   : > { %v570_v24 = vpop.eup %569 }
 0x15c   : > { %v314_v25 = vmul.f32 %v570_v24, %v312_v23 }
 0x15e   : > { %v315_v26 = vsub.f32 2.0, %v314_v25 }
 0x160   : > { %v316_v27 = vmul.f32 %v570_v24, %v315_v26 }
 0x162   : > { %v317_v28 = vmul.f32 %v568_v16, %v316_v27 }
 0x164   : > { %v319_v29 = vsel %vm295_vm2, %v317_v28, 0.0  ;;  %318 = vst.msk [vmem:[%s210_s18] sm:$0xff] %vm295_vm2, %v317_v28 }
 0x165   : > { %320 = vadd.xlane.f32.xlu0 %v319_v29 }
 0x166   : > { %638 = shalt.err (!%p635_p0)
}
 0x167   : > { %s639_s7 = scalar_lea.hbm %s361_s25, 128  ;;  %s643_s21 = scalar_lea.hbm %s944_s3, 256 }
 0x168   : > { %p640_p5 = scmp.ne.s32.totalorder %s361_s25, %s639_s7  ;;  %p644_p1 = scmp.lt.s32.totalorder %s361_s25, %s944_s3 }
 0x169   : > { %p645_p4 = scmp.lt.s32.totalorder %s643_s21, %s639_s7 }
 0x16a   : > { %p641_p9 = pnand %p640_p5, %p960_p3 }
 0x16b   : > { %p646_p6 = por %p645_p4, %p644_p1 }
 0x16c   : > { %p642_p12 = pneg %p641_p9 }
 0x16e   : > { %p647_p8 = pnand %p646_p6, %p642_p12 }
 0x170   : > { %650 = shalt.err (!%p647_p8)
}
 0x171   : > { %506 = dma.vmem_to_hbm [thread:$0]  (%p960_p3), %s364_s17, 128, %s361_s25, %s337_s28   ;;  %vm330_vm3 = vcmask 253952  }
 0x172   : > { %s485_s18 = sshll.u32 %s774_s16, 4  ;;  %s203_s20 = scalar_lea.vmem [#allocation7], %s860_s11 }
 0x173   : > { %s350_s22 = sshll.u32 %s203_s20, 4  ;;  %s348_s17 = scalar_lea.hbm %s943_s2, %s485_s18  ;;  %s351_s22 = int_to_ptr.vmem [resolvable:$true] %s350_s22 }
 0x174   : > { %s333_s25 = scalar_lea.sflag [#allocation4], %s860_s11  ;;  %s651_s28 = scalar_lea.vmem %s351_s22, 16 }
 0x175   : > { %p652_p11 = scmp.ne.s32.totalorder %s351_s22, %s651_s28  ;;  %s732_s30 = smov [#allocation7]  }
 0x176   : > { %s655_s4 = sshll.u32 %s732_s30, 4  ;;  %s656_s4 = int_to_ptr.vmem [resolvable:$false] %s655_s4 }
 0x177   : > { %p653_p7 = pnand %p652_p11, %p960_p3  ;;  %s657_s16 = scalar_lea.vmem %s656_s4, 32 }
 0x178   : > { %p658_p2 = scmp.lt.s32.totalorder %s351_s22, %s656_s4  ;;  %p659_p13 = scmp.lt.s32.totalorder %s657_s16, %s651_s28 }
 0x179   : > { %p654_p10 = pneg %p653_p7 }
 0x17a   : > { %p660_p0 = por %p659_p13, %p658_p2 }
 0x17c   : > { %p661_p5 = pnand %p660_p0, %p654_p10 }
 0x1ee   : > { %v321_v30 = vpop.xlane.xlu0 %320 }
 0x1ef   : > { %v322_v31 = vmul.f32 %v321_v30, %v876_v3 }
 0x1f1   : > { %v323_v32 = vsel %vm214_vm1, %v322_v31, 0.0 }
 0x1f2   : > { %v324_v33 = vrot.slane %v323_v32, 4 }
 0x1f4   : > { %v325_v34 = vadd.f32 %v324_v33, %v323_v32 }
 0x1f6   : > { %v326_v35 = vrot.slane %v325_v34, 2 }
 0x1f8   : > { %v327_v36 = vadd.f32 %v326_v35, %v325_v34 }
 0x1fa   : > { %v328_v37 = vrot.slane %v327_v36, 1 }
 0x1fc   : > { %v329_v38 = vadd.f32 %v328_v37, %v327_v36 }
 0x1fe   : > { %331 = vst.msk [vmem:[%s203_s20] sm:$0x1] %vm330_vm3, %v329_v38 }
 0x1ff   : > { %664 = shalt.err (!%p661_p5)
}
 0x200   : > { %s665_s8 = scalar_lea.hbm %s348_s17, 16  ;;  %s669_s9 = scalar_lea.hbm %s943_s2, 32 }
 0x201   : > { %p666_p9 = scmp.ne.s32.totalorder %s348_s17, %s665_s8  ;;  %p670_p4 = scmp.lt.s32.totalorder %s348_s17, %s943_s2 }
 0x202   : > { %p671_p6 = scmp.lt.s32.totalorder %s669_s9, %s665_s8 }
 0x203   : > { %p667_p12 = pnand %p666_p9, %p960_p3 }
 0x204   : > { %p672_p8 = por %p671_p6, %p670_p4 }
 0x205   : > { %p668_p1 = pneg %p667_p12 }
 0x207   : > { %p673_p11 = pnand %p672_p8, %p668_p1 }
 0x209   : > { %676 = shalt.err (!%p673_p11)
}
 0x20a   : > { %505 = dma.vmem_to_hbm [thread:$0]  (%p960_p3), %s351_s22, 16, %s348_s17, %s333_s25  }
 0x20b PF: > { %s375_s26 = sand.u32 1, %s711_s12   ;;  %p961_p7 = scmp.ne.s32.totalorder %s950_s19, 0 }
 0x20c   : > { %p962_p10 = scmp.ge.s32.totalorder %s723_s15, 2  ;;  %s376_s27 = scalar_lea.sflag [#allocation4], %s375_s26 }
 0x20e   : > { %p518_p2 = pnand %p962_p10, %p961_p7 }
 0x210   : > { %p519_p13 = pneg %p518_p2 }
 0x212   : > { %702 = dma.done.wait (%p519_p13), %s376_s27, 16  }
 0x213   : > { %704 = vsyncadd (%p519_p13), %s376_s27, 4294967280  ;;  %s384_s18 = scalar_lea.sflag [#allocation9], %s375_s26 }
 0x214   : > { %706 = dma.done.wait (%p519_p13), %s384_s18, 128  }
 0x215   : > { %708 = vsyncadd (%p519_p13), %s384_s18, 4294967168  ;;  %p21_p3 = scmp.ge.s32.totalorder %s807_s24, 4   ;;  %s963_s12 = smov %s715_s13 }
 0x216   : > { %s964_s13 = smov %s719_s14  ;;  %s965_s14 = smov %s824_s5 }
 0x217   : > { %s966_s15 = smov %s807_s24  ;;  %23 = sbr.rel (!%p21_p3) target bundleno = 8 (0x8), region = 94 }
 0x21c   :  { %389 = vsyncpa [#allocation3], 1 }
 0x21d   :  { %391 = vsyncpa [#allocation3 + $0x1], 1 }
 0x21e   :  { %392 = vsyncpa [#allocation6], 1 }
 0x21f   :  { %393 = vsyncpa [#allocation4], 1 }
 0x220   :  { %395 = vsyncpa [#allocation4 + $0x1], 1 }
 0x221   :  { %396 = vsyncpa [#allocation9], 1 }
 0x222   :  { %398 = vsyncpa [#allocation9 + $0x1], 1 }

</bundles_post_ra>
